<compile_context>
chip_gen: v7x
topology: tpu7x:2x2x1
jax: 0.10.0
libtpu: 0.0.40
codegen_flags: <defaults>
</compile_context>

<pallas_src>
import jax
import jax.numpy as jnp
from jax.experimental import pallas as pl
from jax.experimental.pallas import tpu as pltpu

_SUBLANES = 8
_LANES = 128


def _scale_kernel(hw_ref, out_ref):
    # hw_ref : SMEM int32 [2]        -> [image_height, image_width]
    # out_ref: VMEM f32  [8, 128]    -> alternating [w, h, w, h, ...] (full native tile,
    #                                   unmasked store; wrapper slices [0, :4]).
    h = hw_ref[0].astype(jnp.float32)
    w = hw_ref[1].astype(jnp.float32)
    col = jax.lax.broadcasted_iota(jnp.int32, (_SUBLANES, _LANES), 1)
    out_ref[...] = jnp.where((col % 2) == 0, w, h)


_scale_pallas = pl.pallas_call(
    _scale_kernel,
    out_shape=jax.ShapeDtypeStruct((_SUBLANES, _LANES), jnp.float32),
    in_specs=[pl.BlockSpec(memory_space=pltpu.MemorySpace.SMEM)],
    out_specs=pl.BlockSpec(memory_space=pltpu.MemorySpace.VMEM),
)


@jax.jit
def scale_from_array(hw):
    """Pallas path for traced inputs.

    hw: int32 array of shape (2,) = [image_height, image_width] (device-resident /
    traced, so one compile serves every image size). Returns f32 (4,) = [w, h, w, h].
    """
    tile = _scale_pallas(hw.astype(jnp.int32))
    return tile[0, :4]


def scale(image_height, image_width):
    """Equivalent of Scale.forward. Returns f32 array of shape (4,)."""
    if isinstance(image_height, (int, float)) and isinstance(image_width, (int, float)):
        # Static dims: bake as a compile-time constant — no kernel, no DMA, no dispatch.
        return jnp.asarray(
            [image_width, image_height, image_width, image_height], dtype=jnp.float32
        )
    hw = jnp.stack(
        [jnp.asarray(image_height, jnp.int32), jnp.asarray(image_width, jnp.int32)]
    )
    return scale_from_array(hw)


# ---------------------------------------------------------------------------
# Fused-consumer pattern (review item #2): the RetinaFace decode multiplies boxes
# of shape (N, 4) by [w, h, w, h]. Building that broadcast inside the consumer's
# kernel avoids a second launch and the 16-byte HBM round-trip entirely.
# ---------------------------------------------------------------------------
def _scale_boxes_kernel(hw_ref, boxes_ref, out_ref):
    # hw_ref   : SMEM int32 [2]   -> [image_height, image_width]
    # boxes_ref: VMEM f32  [N, 4]
    # out_ref  : VMEM f32  [N, 4] = boxes * [w, h, w, h]
    h = hw_ref[0].astype(jnp.float32)
    w = hw_ref[1].astype(jnp.float32)
    col = jax.lax.broadcasted_iota(jnp.int32, out_ref.shape, 1)
    s = jnp.where((col % 2) == 0, w, h)  # broadcast vreg; never hits HBM
    out_ref[...] = boxes_ref[...] * s


@jax.jit
def scale_boxes(boxes, hw):
    """boxes: f32 (N, 4); hw: int32 (2,) = [h, w]. Returns boxes * [w, h, w, h]."""
    return pl.pallas_call(
        _scale_boxes_kernel,
        out_shape=jax.ShapeDtypeStruct(boxes.shape, jnp.float32),
        in_specs=[
            pl.BlockSpec(memory_space=pltpu.MemorySpace.SMEM),
            pl.BlockSpec(memory_space=pltpu.MemorySpace.VMEM),
        ],
        out_specs=pl.BlockSpec(memory_space=pltpu.MemorySpace.VMEM),
    )(hw.astype(jnp.int32), boxes)


if __name__ == "__main__":
    key = jax.random.PRNGKey(0)
    hk, wk, bk = jax.random.split(key, 3)

    # Keep h/w on device (traced into the jitted caller): one compile serves any
    # image size, no per-call host->device scalar copy.
    image_height = jax.random.randint(hk, (), 64, 512, dtype=jnp.int32)
    image_width = jax.random.randint(wk, (), 64, 512, dtype=jnp.int32)
    hw = jnp.stack([image_height, image_width])

    # 1) Pallas kernel path.
    result = scale_from_array(hw)
    jax.block_until_ready(result)

    expected = jnp.stack(
        [image_width, image_height, image_width, image_height]
    ).astype(jnp.float32)
    assert result.shape == (4,)
    assert result.dtype == jnp.float32
    assert bool(jnp.all(result == expected))

    # 2) Static fast path: constant-folded, no kernel launch.
    static = scale(480, 640)
    assert bool(
        jnp.all(static == jnp.asarray([640.0, 480.0, 640.0, 480.0], jnp.float32))
    )

    # 3) Fused-consumer demo: scale a small box tensor in a single kernel.
    boxes = jax.random.uniform(bk, (8, 4), dtype=jnp.float32)
    scaled = scale_boxes(boxes, hw)
    jax.block_until_ready(scaled)
    assert bool(jnp.allclose(scaled, boxes * expected[None, :]))

    print("KERNEL_OK")
</pallas_src>

<mosaic_0001>
module attributes {stable_mosaic.version = 11 : i64} {
  func.func @_scale_kernel(%arg0: memref<2xi32, #tpu.memory_space<smem>>, %arg1: memref<8x128xf32, #tpu.memory_space<vmem>>) attributes {dimension_semantics = [], scalar_prefetch = 0 : i64, scratch_operands = 0 : i64, tpu.core_type = #tpu.core_type<tc>} {
    %c0 = arith.constant 0 : index
    %0 = memref.load %arg0[%c0] : memref<2xi32, #tpu.memory_space<smem>>
    %1 = arith.sitofp %0 : i32 to f32
    %c1 = arith.constant 1 : index
    %2 = memref.load %arg0[%c1] : memref<2xi32, #tpu.memory_space<smem>>
    %3 = arith.sitofp %2 : i32 to f32
    %4 = tpu.iota {dimensions = array<i32: 1>} : vector<8x128xi32>
    %c2_i32 = arith.constant 2 : i32
    %c0_i32 = arith.constant 0 : i32
    %5 = arith.cmpi eq, %c2_i32, %c0_i32 : i32
    %c1_i32 = arith.constant 1 : i32
    %6 = arith.select %5, %c1_i32, %c2_i32 : i32
    %7 = vector.broadcast %6 : i32 to vector<8x128xi32>
    %8 = arith.remsi %4, %7 : vector<8x128xi32>
    %c0_i32_0 = arith.constant 0 : i32
    %9 = vector.broadcast %c0_i32_0 : i32 to vector<8x128xi32>
    %10 = arith.cmpi ne, %8, %9 : vector<8x128xi32>
    %c0_i32_1 = arith.constant 0 : i32
    %11 = vector.broadcast %c0_i32_1 : i32 to vector<8x128xi32>
    %12 = arith.cmpi slt, %8, %11 : vector<8x128xi32>
    %c0_i32_2 = arith.constant 0 : i32
    %13 = arith.cmpi slt, %6, %c0_i32_2 : i32
    %14 = vector.broadcast %13 : i1 to vector<8x128xi1>
    %15 = vector.broadcast %14 : vector<8x128xi1> to vector<8x128xi1>
    %16 = arith.xori %12, %15 : vector<8x128xi1>
    %17 = arith.andi %16, %10 : vector<8x128xi1>
    %18 = vector.broadcast %6 : i32 to vector<8x128xi32>
    %19 = arith.addi %8, %18 : vector<8x128xi32>
    %20 = arith.select %17, %19, %8 : vector<8x128xi1>, vector<8x128xi32>
    %c0_i32_3 = arith.constant 0 : i32
    %21 = vector.broadcast %c0_i32_3 : i32 to vector<8x128xi32>
    %22 = arith.cmpi eq, %20, %21 : vector<8x128xi32>
    %23 = vector.broadcast %3 : f32 to vector<8x128xf32>
    %24 = vector.broadcast %1 : f32 to vector<8x128xf32>
    %25 = arith.select %22, %23, %24 : vector<8x128xi1>, vector<8x128xf32>
    %c0_4 = arith.constant 0 : index
    %c0_5 = arith.constant 0 : index
    %26 = vector.load %arg1[%c0_4, %c0_5] : memref<8x128xf32, #tpu.memory_space<vmem>>, vector<8x128xf32>
    tpu.vector_store %arg1[%c0_4, %c0_5], %25 {strides = array<i32>} : memref<8x128xf32, #tpu.memory_space<vmem>>, vector<8x128xf32>,
    return
  }
}

</mosaic_0001>

<bundles_post_ra>
// kernel: scale_from_array.1
= control target key start
LH: loop header
LB: loop body
LE: loop exit
PB: predicated region body
PF: predicated region fallthrough
CT: control target
= control target key end

     0   :  { %6 = vsyncpa [#allocation3], 0  ;;  %s87_s0 = inlined_call_operand.hbm [shape: s32[2], index: 0, kind: input, shape index: {}]   ;;  %s88_s1 = inlined_call_operand.vmem [shape: f32[8,128], index: 1, kind: output, shape index: {}]  }
   0x1   :  { %s49_s8 = scalar_lea.hbm %s87_s0, 16 }
   0x2   :  { %p50_p0 = scmp.ne.s32.totalorder %s87_s0, %s49_s8  ;;  %p53_p1 = scmp.lt.u32.totalorder %s49_s8, %s87_s0 }
   0x4   :  { %p55_p2 = pnand %p53_p1, %p50_p0 }
   0x6   :  { %58 = shalt.err (!%p55_p2)
}
   0x7   :  { %s61_s13 = smov [#allocation2]  }
   0x8   :  { %14 = dma.hbm_to_smem %s87_s0, 16, %s61_s13, [#allocation3]  }
   0x9   :  { %59 = dma.done.wait [#allocation3], 16  }
   0xa   :  { %60 = vsyncadd [#allocation3], 4294967280 }
   0xb   :  { %18 = sfence }
   0xc   :  { %s19_s16 = sld [smem:[#allocation2]]  ;;  %s47_s17 = sld [smem:[#allocation2 + $0x1]]  ;;  %v23_v0 = vlaneseq }
   0xe   :  { %v24_v1 = vand.u32 127, %v23_v0 }
  0x10   :  { %v29_v2 = vand.u32 1, %v24_v1 }
  0x12   :  { %s20_s18 = scvt.s32.f32 %s19_s16  ;;  %s22_s19 = scvt.s32.f32 %s47_s17  ;;  %vm37_vm0 = vcmp.eq.s32.totalorder %v29_v2, 0 }
  0x14   :  { %v38_v3 = vstv %s22_s19  ;;  %v39_v4 = vstv %s20_s18 }
  0x15   :  { %v40_v5 = vsel %vm37_vm0, %v38_v3, %v39_v4 }
  0x16   :  { %41 = vst [vmem:[%s88_s1] sm:$0xff] %v40_v5 }
  0x17   :  { %46 = vsyncpa [#allocation3], 1 }

</bundles_post_ra>
